<compile_context>
chip_gen: v5e
topology: v5e:2x2
jax: 0.10.0
libtpu: 0.0.40
codegen_flags: <defaults>
</compile_context>

<pallas_src>
import math
from collections import namedtuple

import jax
import jax.numpy as jnp
from jax.experimental import pallas as pl
from jax.experimental.pallas import tpu as pltpu

SphericalPointCloud = namedtuple("SphericalPointCloud", ["xyz", "feats", "anchors"])


# ----------------------------------------------------------------------------
# Pallas kernel 1: inter ZP convolution, grid = (B, NA, P-tiles)
# ----------------------------------------------------------------------------
def _inter_zpconv_kernel(gfeat_ref, wker_ref, wflat_ref, conv_ref, pf_sc):
    # gfeat_ref: (Cin, NN, PT)   bf16 gathered neighbor features (one b, anchor, P tile)
    # wker_ref : (KS, NN, PT)    bf16 kernel-point correlation weights
    # wflat_ref: (Cout, KS*Cin)  bf16 flattened conv weights, Wf[o, k*Cin+c] = W[k,o,c]
    # conv_ref : (Cout, PT)      bf16 per-anchor conv output (pre anchor-mix)
    # pf_sc    : (KS*Cin, PT)    f32 VMEM scratch for the NN-reduced correlation
    cin = gfeat_ref.shape[0]
    ks = wker_ref.shape[0]

    g = gfeat_ref[...].astype(jnp.float32)                      # [Cin, NN, PT]

    # Kernel-point correlation, NN-reduced per (anchor from grid, k) so only a
    # [Cin, NN, PT] temporary is ever live (no [NA,KS,Cin,NN,P] blow-up).
    # KS is a tiny static trip count -> unrolled Python loop is fine.
    for k in range(ks):
        wk = wker_ref[k].astype(jnp.float32)                    # [NN, PT]
        pf_sc[pl.ds(k * cin, cin), :] = jnp.sum(g * wk[None, :, :], axis=1)

    # Single MXU matmul with K = KS*Cin (bf16 operands, f32 accumulation).
    pf = pf_sc[...].astype(wflat_ref.dtype)                     # [KS*Cin, PT]
    conv_ref[...] = jnp.dot(wflat_ref[...], pf,
                            preferred_element_type=jnp.float32
                            ).astype(conv_ref.dtype)


# ----------------------------------------------------------------------------
# Pallas kernel 2: BatchNorm apply (per-channel affine from batch stats) + ReLU
# ----------------------------------------------------------------------------
def _bn_relu_kernel(x_ref, scale_ref, shift_ref, out_ref):
    # x_ref: (Cout, PT) bf16; out_ref: (Cout, PT) f32
    # scale/shift: (Cout, PT) f32 lane-dense per-channel affine (loaded once:
    # their block index is constant across the grid).
    x = x_ref[...].astype(jnp.float32)
    out_ref[...] = jnp.maximum(x * scale_ref[...] + shift_ref[...], 0.0)


# ----------------------------------------------------------------------------
# Geometry glue (stands in for zptk grouping ops — plain JAX, like the CUDA ops)
# ----------------------------------------------------------------------------
def _fibonacci_sphere(n):
    i = jnp.arange(n, dtype=jnp.float32) + 0.5
    phi = jnp.arccos(jnp.clip(1.0 - 2.0 * i / n, -1.0, 1.0))
    theta = jnp.float32(math.pi * (1.0 + math.sqrt(5.0))) * i
    return jnp.stack([jnp.sin(phi) * jnp.cos(theta),
                      jnp.sin(phi) * jnp.sin(theta),
                      jnp.cos(phi)], axis=-1)                       # [n, 3]


def _zp_grouping(xyz, stride, n_neighbor, anchors, kpts, radius, aperture, sigma):
    # xyz: [B, P, 3].  Returns inter_w already in kernel layout [B, NA, KS, NN, P'].
    new_xyz = xyz[:, ::stride]                                      # lazy sample [B,P',3]
    d2 = jnp.sum((new_xyz[:, :, None, :] - xyz[:, None, :, :]) ** 2, axis=-1)
    _, idx = jax.lax.top_k(-d2, n_neighbor)                         # [B, P', NN]
    nb = jax.vmap(lambda pts, ii: pts[ii])(xyz, idx)                # [B, P', NN, 3]
    rel = nb - new_xyz[:, :, None, :]                               # [B, P', NN, 3]

    relT = jnp.transpose(rel, (0, 2, 1, 3))                         # [B, NN, P', 3]
    rn2 = jnp.sum(relT ** 2, axis=-1)                               # [B, NN, P']
    rnorm = jnp.sqrt(rn2 + 1e-12)                                   # [B, NN, P']

    # Gaussian kernel-point correlation via the expanded quadratic form
    # |rel - kpt|^2 = |rel|^2 + |kpt|^2 - 2 rel.kpt  (no [B,NA,KS,NN,P',3] temp).
    dotk = jnp.einsum('bnpd,akd->baknp', relT, kpts)                # [B,NA,KS,NN,P']
    kn2 = jnp.sum(kpts ** 2, axis=-1)                               # [NA, KS]
    dist2 = rn2[:, None, None] + kn2[None, :, :, None, None] - 2.0 * dotk
    w = jnp.exp(-dist2 / (2.0 * sigma))

    cosang = jnp.einsum('bnpd,ad->banp', relT / rnorm[..., None], anchors)  # [B,NA,NN,P']
    mask = ((cosang >= math.cos(aperture)) | (rnorm[:, None] < 1e-6)) \
           & (rnorm[:, None] <= radius)                             # [B, NA, NN, P']
    w = w * mask[:, :, None, :, :].astype(w.dtype)
    w = w / (jnp.sum(w, axis=3, keepdims=True) + 1e-6)              # normalize over NN
    return new_xyz, idx, w                                          # w: [B,NA,KS,NN,P']


def _anchor_mix(anchors, anchor_nn):
    na = anchors.shape[0]
    cosaa = anchors @ anchors.T
    _, aidx = jax.lax.top_k(cosaa, anchor_nn)                       # [NA, anchor_nn]
    mix = jnp.zeros((na, na), jnp.float32)
    mix = mix.at[jnp.arange(na)[:, None], aidx].set(1.0 / anchor_nn)  # mix[dst, src]
    return mix.T                                                      # [src, dst]


def _pick_p_tile(pout, p_tile=None):
    if p_tile is not None:
        assert pout % p_tile == 0, (pout, p_tile)
        assert p_tile % 128 == 0 or p_tile == pout, p_tile
        return p_tile
    for t in (512, 256, 128):
        if pout % t == 0:
            return t
    return pout


# ----------------------------------------------------------------------------
# Block wrapper (forward pass of InterZPConvBlock)
# ----------------------------------------------------------------------------
def inter_zpconv_block(xyz, feats, W, gamma, beta, *, kernel_size, stride,
                       radius, aperture, sigma, n_anchors, n_neighbor,
                       anchor_nn, inter_idx=None, inter_w=None, p_tile=None,
                       compute_dtype=jnp.bfloat16):
    B, Cin, P, NA = feats.shape
    assert NA == n_anchors
    KS = kernel_size
    Cout = W.shape[1]

    anchors = _fibonacci_sphere(n_anchors)                          # [NA, 3]
    kgrid = jnp.linspace(0.0, radius, KS).astype(jnp.float32)
    kpts = anchors[:, None, :] * kgrid[None, :, None]               # [NA, KS, 3]

    if inter_idx is None or inter_w is None:
        new_xyz, inter_idx, inter_w = _zp_grouping(
            xyz, stride, n_neighbor, anchors, kpts, radius, aperture, sigma)
    else:
        new_xyz = xyz[:, ::stride]

    Pout = new_xyz.shape[1]
    NN = inter_idx.shape[-1]
    PT = _pick_p_tile(Pout, p_tile)
    NPT = Pout // PT

    # Gather neighbor features directly in kernel layout [B, NA, Cin, NN, P']
    # (no full-size gfeat transpose: index-array order drives the output order).
    ft = jnp.transpose(feats, (0, 3, 1, 2))                         # [B, NA, Cin, P]
    idx_t = jnp.swapaxes(inter_idx, 1, 2)                           # [B, NN, P']
    gfeat = jax.vmap(lambda f, ii: f[:, :, ii])(ft, idx_t)          # [B, NA, Cin, NN, P']
    gfeat = gfeat.astype(compute_dtype)
    wker = inter_w.astype(compute_dtype)                            # [B, NA, KS, NN, P']

    # Flattened conv weights for a single K = KS*Cin MXU matmul.
    wflat = jnp.transpose(W, (1, 0, 2)).reshape(Cout, KS * Cin).astype(compute_dtype)
    amix = _anchor_mix(anchors, anchor_nn)                          # [NA, NA] (src, dst)

    flops = 2 * B * NA * Cout * KS * Cin * Pout + 2 * B * NA * KS * Cin * NN * Pout
    bytes_accessed = (gfeat.size * gfeat.dtype.itemsize
                      + wker.size * wker.dtype.itemsize
                      + wflat.size * wflat.dtype.itemsize
                      + B * NA * Cout * Pout * 2)                   # bf16 conv out

    # 48 MiB scoped VMEM: above the v5e/v6e defaults, below v7x's 64 MiB physical.
    cparams = pltpu.CompilerParams(
        dimension_semantics=("parallel", "parallel", "parallel"),
        vmem_limit_bytes=48 * 1024 * 1024)

    conv = pl.pallas_call(
        _inter_zpconv_kernel,
        out_shape=jax.ShapeDtypeStruct((B, NA, Cout, Pout), compute_dtype),
        grid=(B, NA, NPT),
        in_specs=[
            pl.BlockSpec((None, None, Cin, NN, PT), lambda b, a, p: (b, a, 0, 0, p)),
            pl.BlockSpec((None, None, KS, NN, PT), lambda b, a, p: (b, a, 0, 0, p)),
            pl.BlockSpec((Cout, KS * Cin), lambda b, a, p: (0, 0)),
        ],
        out_specs=pl.BlockSpec((None, None, Cout, PT), lambda b, a, p: (b, a, 0, p)),
        scratch_shapes=[pltpu.VMEM((KS * Cin, PT), jnp.float32)],
        compiler_params=cparams,
        cost_estimate=pl.CostEstimate(flops=flops, transcendentals=0,
                                      bytes_accessed=bytes_accessed),
    )(gfeat, wker, wflat)                                           # [B, NA, Cout, P'] bf16

    # Anchor-neighborhood ("ZP") mixing as ONE batched matmul (f32 accumulation,
    # bf16 storage).  TODO(synk): kept in XLA (not fused into the Pallas kernel)
    # because an in-kernel formulation for small NA would either need a
    # lane-hostile [.., P, NA] layout or NA^2 scalar-broadcast FMAs.
    mixed = jnp.einsum('ad,baop->bdop', amix,
                       conv.astype(jnp.float32)).astype(compute_dtype)

    # BatchNorm2d training-mode statistics: global per-channel over (B, NA, P')
    # via one fused XLA reduction in f32; normalize+affine+ReLU is gridded.
    mixed_f32 = mixed.astype(jnp.float32)
    mean = jnp.mean(mixed_f32, axis=(0, 1, 3))                      # [Cout]
    var = jnp.var(mixed_f32, axis=(0, 1, 3))                        # [Cout]
    scale = gamma * jax.lax.rsqrt(var + 1e-5)                       # [Cout]
    shift = beta - mean * scale                                     # [Cout]
    scale_b = jnp.broadcast_to(scale[:, None], (Cout, PT)).astype(jnp.float32)
    shift_b = jnp.broadcast_to(shift[:, None], (Cout, PT)).astype(jnp.float32)

    bn = pl.pallas_call(
        _bn_relu_kernel,
        out_shape=jax.ShapeDtypeStruct((B, NA, Cout, Pout), jnp.float32),
        grid=(B, NA, NPT),
        in_specs=[
            pl.BlockSpec((None, None, Cout, PT), lambda b, a, p: (b, a, 0, p)),
            pl.BlockSpec((Cout, PT), lambda b, a, p: (0, 0)),
            pl.BlockSpec((Cout, PT), lambda b, a, p: (0, 0)),
        ],
        out_specs=pl.BlockSpec((None, None, Cout, PT), lambda b, a, p: (b, a, 0, p)),
        compiler_params=cparams,
    )(mixed, scale_b, shift_b)                                      # [B, NA, Cout, P'] f32

    # Final layout [B, Cout, P', NA] (PyTorch NCHW analogue); left to XLA because
    # putting the tiny NA axis on lanes inside the kernel would be lane-sparse.
    feat_out = jnp.transpose(bn, (0, 2, 3, 1))
    debug = (gfeat, wker, wflat, amix, conv, mixed, bn)
    return inter_idx, inter_w, SphericalPointCloud(new_xyz, feat_out, anchors), debug


# ----------------------------------------------------------------------------
def _reference(gfeat, wker, wflat, amix, gamma, beta, compute_dtype=jnp.bfloat16):
    # Pure-JAX mirror of the kernel path (including bf16 storage roundings).
    g = gfeat.astype(jnp.float32)
    wk = wker.astype(jnp.float32)
    KS = wker.shape[2]
    Cin = gfeat.shape[2]
    Cout = wflat.shape[0]
    pf = jnp.einsum('bacnp,baknp->bakcp', g, wk)                    # [B,NA,KS,Cin,P]
    pf = pf.astype(compute_dtype).astype(jnp.float32)               # MXU operand cast
    W3 = wflat.astype(jnp.float32).reshape(Cout, KS, Cin)
    conv = jnp.einsum('bakcp,okc->baop', pf, W3)                    # [B,NA,Cout,P]
    conv = conv.astype(compute_dtype).astype(jnp.float32)           # bf16 conv storage
    mixed = jnp.einsum('ad,baop->bdop', amix, conv)
    mixed = mixed.astype(compute_dtype).astype(jnp.float32)         # bf16 mixed storage
    mean = jnp.mean(mixed, axis=(0, 1, 3), keepdims=True)
    var = jnp.mean((mixed - mean) ** 2, axis=(0, 1, 3), keepdims=True)
    y = (mixed - mean) * jax.lax.rsqrt(var + 1e-5)
    y = y * gamma.reshape(1, 1, -1, 1) + beta.reshape(1, 1, -1, 1)
    return jnp.maximum(y, 0.0)


if __name__ == "__main__":
    key = jax.random.PRNGKey(0)
    B, Cin, Cout = 2, 4, 8
    P, NA = 256, 4
    KS, NN, ANCHOR_NN = 3, 8, 2
    STRIDE = 1
    RADIUS, APERTURE, SIGMA = 0.4, math.pi / 3, 0.05

    kx, kf, kw = jax.random.split(key, 3)
    xyz = jax.random.uniform(kx, (B, P, 3), jnp.float32, minval=-0.5, maxval=0.5)
    feats = jax.random.normal(kf, (B, Cin, P, NA), jnp.float32)

    # deterministic parameter init (matches zptk.BasicZPConv W + BatchNorm2d affine)
    W = jax.random.normal(kw, (KS, Cout, Cin), jnp.float32) / math.sqrt(Cin * KS)
    gamma = jnp.ones((Cout,), jnp.float32)
    beta = jnp.zeros((Cout,), jnp.float32)

    inter_idx, inter_w, spc, dbg = inter_zpconv_block(
        xyz, feats, W, gamma, beta,
        kernel_size=KS, stride=STRIDE, radius=RADIUS, aperture=APERTURE,
        sigma=SIGMA, n_anchors=NA, n_neighbor=NN, anchor_nn=ANCHOR_NN,
        p_tile=128)

    out_feat = jax.block_until_ready(spc.feats)
    assert out_feat.shape == (B, Cout, P // STRIDE, NA), out_feat.shape

    gfeat, wker, wflat, amix, _, _, bn = dbg
    ref = _reference(gfeat, wker, wflat, amix, gamma, beta)
    err = float(jnp.max(jnp.abs(bn - ref)))
    assert jnp.allclose(bn, ref, rtol=2e-2, atol=2e-2), err

    print("KERNEL_OK")
</pallas_src>

<mosaic_0001>
module attributes {stable_mosaic.version = 11 : i64} {
  func.func @_inter_zpconv_kernel(%arg0: i32, %arg1: i32, %arg2: i32, %arg3: memref<1x1x4x8x128xbf16, #tpu.memory_space<vmem>>, %arg4: memref<1x1x3x8x128xbf16, #tpu.memory_space<vmem>>, %arg5: memref<8x12xbf16, #tpu.memory_space<vmem>>, %arg6: memref<1x1x8x128xbf16, #tpu.memory_space<vmem>>, %arg7: memref<12x128xf32, #tpu.memory_space<vmem>>) attributes {dimension_semantics = [#tpu.dimension_semantics<parallel>, #tpu.dimension_semantics<parallel>, #tpu.dimension_semantics<parallel>], iteration_bounds = array<i64: 2, 4, 2>, scalar_prefetch = 0 : i64, scratch_operands = 1 : i64, tpu.core_type = #tpu.core_type<tc>, window_params = [{transform_indices = @transform_0, window_bounds = array<i64: 1, 1, 4, 8, 128>}, {transform_indices = @transform_1, window_bounds = array<i64: 1, 1, 3, 8, 128>}, {pipeline_mode = #tpu.pipeline_mode<synchronous>, transform_indices = @transform_2, window_bounds = array<i64: 8, 12>}, {transform_indices = @transform_3, window_bounds = array<i64: 1, 1, 8, 128>}]} {
    %c0 = arith.constant 0 : index
    %c0_0 = arith.constant 0 : index
    %c0_1 = arith.constant 0 : index
    %c0_2 = arith.constant 0 : index
    %c0_3 = arith.constant 0 : index
    %0 = vector.load %arg3[%c0, %c0_0, %c0_1, %c0_2, %c0_3] : memref<1x1x4x8x128xbf16, #tpu.memory_space<vmem>>, vector<1x1x4x8x128xbf16>
    %1 = vector.shape_cast %0 : vector<1x1x4x8x128xbf16> to vector<4x8x128xbf16>
    %2 = arith.extf %1 : vector<4x8x128xbf16> to vector<4x8x128xf32>
    %c0_4 = arith.constant 0 : index
    %c0_5 = arith.constant 0 : index
    %c0_6 = arith.constant 0 : index
    %c0_7 = arith.constant 0 : index
    %c0_8 = arith.constant 0 : index
    %3 = vector.load %arg4[%c0_4, %c0_5, %c0_6, %c0_7, %c0_8] : memref<1x1x3x8x128xbf16, #tpu.memory_space<vmem>>, vector<1x1x1x8x128xbf16>
    %4 = vector.shape_cast %3 : vector<1x1x1x8x128xbf16> to vector<8x128xbf16>
    %5 = arith.extf %4 : vector<8x128xbf16> to vector<8x128xf32>
    %6 = vector.shape_cast %5 : vector<8x128xf32> to vector<1x8x128xf32>
    %7 = vector.broadcast %6 : vector<1x8x128xf32> to vector<4x8x128xf32>
    %8 = arith.mulf %2, %7 : vector<4x8x128xf32>
    %cst = arith.constant dense<0.000000e+00> : vector<4x128xf32>
    %9 = vector.multi_reduction <add>, %8, %cst [1] : vector<4x8x128xf32> to vector<4x128xf32>
    %c0_9 = arith.constant 0 : index
    %c0_10 = arith.constant 0 : index
    %10 = vector.load %arg7[%c0_9, %c0_10] : memref<12x128xf32, #tpu.memory_space<vmem>>, vector<4x128xf32>
    tpu.vector_store %arg7[%c0_9, %c0_10], %9 {strides = array<i32>} : memref<12x128xf32, #tpu.memory_space<vmem>>, vector<4x128xf32>,
    %c0_11 = arith.constant 0 : index
    %c0_12 = arith.constant 0 : index
    %c1 = arith.constant 1 : index
    %c0_13 = arith.constant 0 : index
    %c0_14 = arith.constant 0 : index
    %11 = vector.load %arg4[%c0_11, %c0_12, %c1, %c0_13, %c0_14] : memref<1x1x3x8x128xbf16, #tpu.memory_space<vmem>>, vector<1x1x1x8x128xbf16>
    %12 = vector.shape_cast %11 : vector<1x1x1x8x128xbf16> to vector<8x128xbf16>
    %13 = arith.extf %12 : vector<8x128xbf16> to vector<8x128xf32>
    %14 = vector.shape_cast %13 : vector<8x128xf32> to vector<1x8x128xf32>
    %15 = vector.broadcast %14 : vector<1x8x128xf32> to vector<4x8x128xf32>
    %16 = arith.mulf %2, %15 : vector<4x8x128xf32>
    %cst_15 = arith.constant dense<0.000000e+00> : vector<4x128xf32>
    %17 = vector.multi_reduction <add>, %16, %cst_15 [1] : vector<4x8x128xf32> to vector<4x128xf32>
    %c4 = arith.constant 4 : index
    %c0_16 = arith.constant 0 : index
    %18 = vector.load %arg7[%c4, %c0_16] : memref<12x128xf32, #tpu.memory_space<vmem>>, vector<4x128xf32>
    tpu.vector_store %arg7[%c4, %c0_16], %17 {strides = array<i32>} : memref<12x128xf32, #tpu.memory_space<vmem>>, vector<4x128xf32>,
    %c0_17 = arith.constant 0 : index
    %c0_18 = arith.constant 0 : index
    %c2 = arith.constant 2 : index
    %c0_19 = arith.constant 0 : index
    %c0_20 = arith.constant 0 : index
    %19 = vector.load %arg4[%c0_17, %c0_18, %c2, %c0_19, %c0_20] : memref<1x1x3x8x128xbf16, #tpu.memory_space<vmem>>, vector<1x1x1x8x128xbf16>
    %20 = vector.shape_cast %19 : vector<1x1x1x8x128xbf16> to vector<8x128xbf16>
    %21 = arith.extf %20 : vector<8x128xbf16> to vector<8x128xf32>
    %22 = vector.shape_cast %21 : vector<8x128xf32> to vector<1x8x128xf32>
    %23 = vector.broadcast %22 : vector<1x8x128xf32> to vector<4x8x128xf32>
    %24 = arith.mulf %2, %23 : vector<4x8x128xf32>
    %cst_21 = arith.constant dense<0.000000e+00> : vector<4x128xf32>
    %25 = vector.multi_reduction <add>, %24, %cst_21 [1] : vector<4x8x128xf32> to vector<4x128xf32>
    %c8 = arith.constant 8 : index
    %c0_22 = arith.constant 0 : index
    %26 = vector.load %arg7[%c8, %c0_22] : memref<12x128xf32, #tpu.memory_space<vmem>>, vector<4x128xf32>
    tpu.vector_store %arg7[%c8, %c0_22], %25 {strides = array<i32>} : memref<12x128xf32, #tpu.memory_space<vmem>>, vector<4x128xf32>,
    %c0_23 = arith.constant 0 : index
    %c0_24 = arith.constant 0 : index
    %27 = vector.load %arg7[%c0_23, %c0_24] : memref<12x128xf32, #tpu.memory_space<vmem>>, vector<12x128xf32>
    %28 = arith.truncf %27 : vector<12x128xf32> to vector<12x128xbf16>
    %c0_25 = arith.constant 0 : index
    %c0_26 = arith.constant 0 : index
    %29 = vector.load %arg5[%c0_25, %c0_26] : memref<8x12xbf16, #tpu.memory_space<vmem>>, vector<8x12xbf16>
    %cst_27 = arith.constant dense<0.000000e+00> : vector<8x128xf32>
    %30 = tpu.matmul %29, %28, %cst_27 {dimension_numbers = #tpu.dot_dimension_numbers<[1], [0], [0], [1], [0, 0, 1, 1], [], []>} : vector<8x12xbf16>, vector<12x128xbf16>, vector<8x128xf32> -> vector<8x128xf32>
    %31 = arith.truncf %30 : vector<8x128xf32> to vector<8x128xbf16>
    %c0_28 = arith.constant 0 : index
    %c0_29 = arith.constant 0 : index
    %c0_30 = arith.constant 0 : index
    %c0_31 = arith.constant 0 : index
    %32 = vector.load %arg6[%c0_28, %c0_29, %c0_30, %c0_31] : memref<1x1x8x128xbf16, #tpu.memory_space<vmem>>, vector<1x1x8x128xbf16>
    %33 = vector.shape_cast %32 : vector<1x1x8x128xbf16> to vector<8x128xbf16>
    %34 = vector.shape_cast %31 : vector<8x128xbf16> to vector<1x1x8x128xbf16>
    tpu.vector_store %arg6[%c0_28, %c0_29, %c0_30, %c0_31], %34 {strides = array<i32>} : memref<1x1x8x128xbf16, #tpu.memory_space<vmem>>, vector<1x1x8x128xbf16>,
    return
  }
  func.func @transform_0(%arg0: i32, %arg1: i32, %arg2: i32) -> (i32, i32, i32, i32, i32) {
    %c0_i32 = arith.constant 0 : i32
    %c0_i32_0 = arith.constant 0 : i32
    %c0_i32_1 = arith.constant 0 : i32
    return %arg0, %arg1, %c0_i32, %c0_i32_0, %arg2 : i32, i32, i32, i32, i32
  }
  func.func @transform_1(%arg0: i32, %arg1: i32, %arg2: i32) -> (i32, i32, i32, i32, i32) {
    %c0_i32 = arith.constant 0 : i32
    %c0_i32_0 = arith.constant 0 : i32
    %c0_i32_1 = arith.constant 0 : i32
    return %arg0, %arg1, %c0_i32, %c0_i32_0, %arg2 : i32, i32, i32, i32, i32
  }
  func.func @transform_2(%arg0: i32, %arg1: i32, %arg2: i32) -> (i32, i32) {
    %c0_i32 = arith.constant 0 : i32
    %c0_i32_0 = arith.constant 0 : i32
    %c0_i32_1 = arith.constant 0 : i32
    return %c0_i32, %c0_i32_0 : i32, i32
  }
  func.func @transform_3(%arg0: i32, %arg1: i32, %arg2: i32) -> (i32, i32, i32, i32) {
    %c0_i32 = arith.constant 0 : i32
    %c0_i32_0 = arith.constant 0 : i32
    return %arg0, %arg1, %c0_i32, %arg2 : i32, i32, i32, i32
  }
}

</mosaic_0001>

<bundles_post_ra>
// kernel: tpu_custom_call.1
= control target key start
LH: loop header
LB: loop body
LE: loop exit
PB: predicated region body
PF: predicated region fallthrough
CT: control target
= control target key end

     0   :  { %s1233_s0 = inlined_call_operand.hbm [shape: bf16[2,4,4,8,256], index: 0, kind: input, shape index: {}]   ;;  %s1234_s1 = inlined_call_operand.hbm [shape: bf16[2,4,3,8,256], index: 1, kind: input, shape index: {}]   ;;  %s1235_s2 = inlined_call_operand.hbm [shape: bf16[8,12], index: 2, kind: input, shape index: {}]   ;;  %s1236_s3 = inlined_call_operand.hbm [shape: bf16[2,4,8,256], index: 3, kind: output, shape index: {}]  }
   0x1   :  { %1249 = sst [smem:[#allocation25_spill]] %s1233_s0 }
   0x2   :  { %1250 = sst [smem:[#allocation26_spill]] %s1235_s2 }
   0x3   :  { %1251 = sst [smem:[#allocation27_spill]] %s1236_s3 }
   0x4   :  { %8 = vsyncpa [#allocation4], 0 }
   0x5   :  { %10 = vsyncpa [#allocation4 + $0x1], 0 }
   0x6   :  { %11 = vsyncpa [#allocation7], 0 }
   0x7   :  { %13 = vsyncpa [#allocation7 + $0x1], 0 }
   0x8   :  { %14 = vsyncpa [#allocation5], 0 }
   0x9   :  { %16 = vsyncpa [#allocation5 + $0x1], 0  ;;  %s980_s12 = smov 0   ;;  %s982_s13 = smov 0  }
   0xa   :  { %s984_s14 = smov 0   ;;  %s986_s15 = smov 0  }
   0xb   :  { %s988_s16 = smov 0   ;;  %s990_s17 = smov 0  }
   0xc   :  { %s992_s18 = smov 0   ;;  %s994_s19 = smov 0  }
   0xd   :  { %s996_s20 = smov 0   ;;  %s998_s21 = smov 0  }
   0xe LB: > { %1252 = sst [smem:[#allocation14_spill]] %s918_s12  ;;  %s1031_s22 = sadd.s32 4294967295, %s954_s21   ;;  %s954_s21 = sphi %s998_s21, %s22_s21   ;;  %s950_s20 = sphi %s996_s20, %s1292_s20   ;;  %s946_s19 = sphi %s994_s19, %s1291_s19   ;;  %s942_s18 = sphi %s992_s18, %s1290_s18   ;;  %s938_s17 = sphi %s990_s17, %s1289_s17   ;;  %s934_s16 = sphi %s988_s16, %s1288_s16   ;;  %s930_s15 = sphi %s986_s15, %s1287_s15   ;;  %s926_s14 = sphi %s984_s14, %s1286_s14   ;;  %s922_s13 = sphi %s982_s13, %s1285_s13   ;;  %s918_s12 = sphi %s980_s12, %s1284_s12  }
   0xf   : > { %1253 = sst [smem:[#allocation15_spill]] %s930_s15  ;;  %s594_s23 = sadd.s32 4294967294, %s954_s21  }
  0x10   : > { %1254 = sst [smem:[#allocation16_spill]] %s934_s16  ;;  %p59_p0 = scmp.ne.s32.totalorder %s926_s14, %s922_s13 }
  0x11   : > { %1255 = sst [smem:[#allocation17_spill]] %s938_s17  ;;  %p60_p1 = scmp.eq.s32.totalorder %s954_s21, 0 }
  0x12   : > { %1256 = sst [smem:[#allocation18_spill]] %s1031_s22  ;;  %p65_p2 = scmp.ne.s32.totalorder %s922_s13, %s918_s12 }
  0x13   : > { %p66_p3 = scmp.eq.s32.totalorder %s1031_s22, 0  ;;  %p144_p4 = scmp.eq.s32.totalorder %s1031_s22, 15 }
  0x14   : > { %p1042_p5 = por %p60_p1, %p59_p0  ;;  %p150_p6 = scmp.eq.s32.totalorder %s594_s23, 15 }
  0x15   : > { %p1048_p7 = por %p66_p3, %p65_p2  ;;  %p1052_p8 = por %p144_p4, %p59_p0 }
  0x16   : > { %p1056_p9 = por %p150_p6, %p65_p2  ;;  %p595_p10 = scmp.ge.s32.totalorder %s954_s21, 1 }
  0x17   : > { %s1258_s26 = scalar_select %p1048_p7, 1, 0 }
  0x18   : > { %s1260_s27 = scalar_select %p1052_p8, 1, 0 }
  0x19   : > { %1259 = sst [smem:[#allocation19_spill]] %s1258_s26  ;;  %p157_p11 = scmp.lt.s32.totalorder %s954_s21, 17 }
  0x1a   : > { %1261 = sst [smem:[#allocation20_spill]] %s1260_s27  ;;  %s956_s6 = smov [#allocation8]  }
  0x1b   : > { %s1262_s28 = scalar_select %p1056_p9, 1, 0 }
  0x1c   : > { %s1264_s2 = sld [smem:[#allocation26_spill]]  ;;  %p1065_p12 = pnand %p595_p10, %p157_p11 }
  0x1d   : > { %1263 = sst [smem:[#allocation21_spill]] %s1262_s28  ;;  %s171_s7 = sshll.u32 %s956_s6, 4  ;;  %s172_s7 = int_to_ptr.vmem [resolvable:$true] %s171_s7 }
  0x1e   : > { %p639_p13 = pneg %p1065_p12  ;;  %p655_p0 = scmp.lt.s32.totalorder %s954_s21, 16 }
  0x1f   : > { %s37_s9 = sadd.s32 1, %s946_s19  ;;  %s34_s10 = sadd.s32 1, %s942_s18 }
  0x20   : > { %p640_p1 = pnand %p639_p13, %p66_p3  ;;  %p1076_p2 = pnand %p655_p0, %p1042_p5 }
  0x21   : > { %s41_s11 = sadd.s32 1, %s950_s20  ;;  %p35_p4 = scmp.ge.s32.totalorder %s34_s10, 2 }
  0x22   : > { %s169_s4 = sshll.u32 %s1264_s2, 4  ;;  %s1084_s23 = sand.u32 1, %s926_s14   ;;  %s170_s4 = int_to_ptr.hbm [resolvable:$true] %s169_s4 }
  0x23   : > { %642 = dma.hbm_to_vmem [thread:$0]  (!%p640_p1), %s170_s4, 64, %s172_s7, [#allocation7]  }
  0x24   : > { %s598_s29 = sshll.u32 %s1084_s23, 4  ;;  %s1294_s10 = smov (%p35_p4, %s34_s10), 0 }
  0x25   : > { %1267 = sst [smem:[#allocation22_spill]] %s1294_s10  ;;  %s1296_s9 = smov (!%p35_p4, %s37_s9), %s946_s19 }
  0x26   : > { %s48_s25 = ssub.s32 %s942_s18, %s1294_s10  ;;  %p39_p5 = scmp.ge.s32.totalorder %s1296_s9, 4 }
  0x27   : > { %s599_s30 = sshll.u32 %s946_s19, 3  ;;  %s600_s24 = sshll.u32 %s950_s20, 5 }
  0x28   : > { %s190_s6 = sadd.s32 %s942_s18, %s599_s30  ;;  %s1298_s9 = smov (%p39_p5, %s1296_s9), 0 }
  0x29   : > { %1268 = sst [smem:[#allocation23_spill]] %s1298_s9  ;;  %s1300_s11 = smov (!%p39_p5, %s41_s11), %s950_s20 }
  0x2a   : > { %s46_s4 = ssub.s32 %s946_s19, %s1298_s9  ;;  %s192_s7 = sadd.s32 %s600_s24, %s190_s6 }
  0x2b   : > { %p43_p6 = scmp.ge.s32.totalorder %s1300_s11, 2  ;;  %s601_s2 = sshll.u32 %s192_s7, 2 }
  0x2c   : > { %s1269_s0 = sld [smem:[#allocation25_spill]]  ;;  %s186_s10 = scalar_lea.vmem [#allocation3], %s598_s29 }
  0x2d   : > { %s197_s30 = sshll.u32 %s186_s10, 4  ;;  %s1302_s11 = smov (%p43_p6, %s1300_s11), 0  ;;  %s198_s30 = int_to_ptr.vmem [resolvable:$true] %s197_s30 }
  0x2e   : > { %1270 = sst [smem:[#allocation24_spill]] %s1302_s11  ;;  %s45_s24 = ssub.s32 %s950_s20, %s1302_s11 }
  0x2f   : > { %s47_s6 = sor.u32 %s46_s4, %s45_s24  ;;  %s957_s28 = smov 128  }
  0x30   : > { %s49_s12 = sor.u32 %s48_s25, %s47_s6  ;;  %s958_s7 = smov 64  }
  0x31   : > { %p50_p10 = scmp.eq.s32.totalorder %s49_s12, 0  ;;  %s959_s29 = smov 4  }
  0x32   : > { %s194_s3 = scalar_lea.hbm %s1269_s0, %s601_s2  ;;  %s183_s2 = scalar_lea.sflag [#allocation4], %s1084_s23 }
  0x33   : > { %s195_s27 = sshll.u32 %s194_s3, 4  ;;  %s1271_s10 = sadd.s32 1, %s926_s14  ;;  %s196_s27 = int_to_ptr.hbm [resolvable:$true] %s195_s27 }
  0x34   : > { %646 = dma.hbm_to_vmem [thread:$0]  (!%p1076_p2), %s196_s27, 256, %s198_s30, %s183_s2, %s957_s28, %s958_s7, %s959_s29  }
  0x35   : > { %s1113_s0 = scalar_select %p50_p10, %s926_s14, %s1271_s10  }
  0x36   : > { %s625_s9 = smul.u32 12, %s1084_s23  ;;  %s207_s3 = sand.u32 1, %s954_s21  }
  0x37   : > { %s626_s17 = smul.u32 6, %s946_s19  ;;  %s208_s27 = scalar_lea.sflag [#allocation7], %s207_s3 }
  0x38   : > { %s627_s15 = smul.u32 24, %s950_s20  ;;  %s211_s11 = scalar_lea.vmem [#allocation6], %s625_s9 }
  0x39   : > { %s215_s16 = sadd.s32 %s942_s18, %s626_s17  ;;  %s222_s22 = sshll.u32 %s211_s11, 4  ;;  %s223_s22 = int_to_ptr.vmem [resolvable:$true] %s222_s22 }
  0x3a   : > { %s217_s4 = sadd.s32 %s627_s15, %s215_s16  ;;  %234 = sbr.rel (%p1065_p12) target bundleno = 259 (0x103), region = 32 }
  0x3b   : > { %s602_s25 = sshll.u32 %s217_s4, 2  ;;  %s1128_s17 = sand.u32 (!%p1065_p12), 1, %s922_s13  }
  0x3c   : > { %s219_s12 = scalar_lea.hbm %s1234_s1, %s602_s25  ;;  %s604_s15 = sshll.u32 (!%p1065_p12), %s1128_s17, 4 }
  0x3d   : > { %s220_s26 = sshll.u32 %s219_s12, 4  ;;  %s237_s16 = scalar_lea.sflag (!%p1065_p12), [#allocation4], %s1128_s17  ;;  %s221_s26 = int_to_ptr.hbm [resolvable:$true] %s220_s26 }
  0x3e   : > { %649 = dma.hbm_to_vmem [thread:$0]  (!%p1076_p2), %s221_s26, 192, %s223_s22, %s208_s27, %s957_s28, %s958_s7, %s959_s29  }
  0x3f   : > { %s240_s9 = scalar_lea.vmem [#allocation3], %s604_s15 }
  0x40   : > { %901 = dma.done.wait (%p1048_p7), %s237_s16, 256  }
  0x41   : > { %903 = vsyncadd (%p1048_p7), %s237_s16, 4294967040  ;;  %s1273_s11 = sld [smem:[#allocation18_spill]]  ;;  %s628_s26 = smul.u32 12, %s1128_s17 }
  0x43   : > { %s250_s8 = scalar_lea.vmem [#allocation6], %s628_s26 }
  0x47   : > { %s246_s22 = sand.u32 1, %s1273_s11  }
  0x48   : > { %s247_s5 = scalar_lea.sflag [#allocation7], %s246_s22 }
  0x49   : > { %905 = dma.done.wait (%p1048_p7), %s247_s5, 192  }
  0x4a   : > { %907 = vsyncadd (%p1048_p7), %s247_s5, 4294967104 }
  0x4b   : > { %909 = dma.done.wait (%p66_p3), [#allocation7], 64  }
  0x4c   : > { %911 = vsyncadd (%p66_p3), [#allocation7], 4294967232  ;;  %v617_v0 = vld [vmem:[%s240_s9] sm:$0xff]   ;;  %v624_v1 = vld [vmem:[%s240_s9 + $0x8] sm:$0xff]   ;;  %vm327_vm0 = vcmask 1041409   ;;  %vm329_vm1 = vcmask 1042434  }
  0x4d   : > { %v293_v2 = vld [vmem:[%s250_s8] sm:$0xff]   ;;  %v1146_v3 = vunpack.c.l.bf16 %v617_v0  ;;  %v1148_v4 = vunpack.c.h.bf16 %v617_v0  ;;  %v1150_v5 = vunpack.c.l.bf16 %v624_v1  ;;  %v1152_v6 = vunpack.c.h.bf16 %v624_v1  ;;  %v608_v7 = vld [vmem:[%s250_s8 + $0x8] sm:$0xf]  ;;  %s1274_s30 = sld [smem:[#allocation16_spill]]  ;;  %s606_s24 = sshll.u32 %s1128_s17, 2 }
  0x4e   : > { %v294_v8 = vunpack.c.l.bf16 %v293_v2  ;;  %v337_v9 = vunpack.c.h.bf16 %v293_v2  ;;  %v1154_v10 = vunpack.c.l.bf16 %v608_v7  ;;  %vm331_vm2 = vcmask 1043459   ;;  %s1275_s2 = sld [smem:[#allocation15_spill]]  ;;  %s283_s15 = scalar_lea.vmem [#allocation9], %s606_s24 }
  0x4f   : > { %s1276_s28 = sld [smem:[#allocation17_spill]]  ;;  %vm423_vm3 = vcmask 1045504   ;;  %vm419_vm4 = vcmask 97280   ;;  %s459_s16 = sshll.u32 %s283_s15, 4  ;;  %s460_s16 = int_to_ptr.vmem [resolvable:$true] %s459_s16 }
  0x50   : > { %v295_v11 = vmul.f32 %v1146_v3, %v294_v8  ;;  %v296_v12 = vmul.f32 %v1148_v4, %v294_v8  ;;  %v297_v13 = vmul.f32 %v1150_v5, %v294_v8  ;;  %v298_v14 = vmul.f32 %v1152_v6, %v294_v8  ;;  %s1278_s27 = sld [smem:[#allocation27_spill]]  ;;  %s443_s11 = scalar_lea.sflag [#allocation5], %s1128_s17 }
  0x51   : > { %v338_v15 = vmul.f32 %v1146_v3, %v337_v9  ;;  %v339_v16 = vmul.f32 %v1148_v4, %v337_v9  ;;  %v340_v17 = vmul.f32 %v1150_v5, %v337_v9  ;;  %v341_v18 = vmul.f32 %v1152_v6, %v337_v9 }
  0x52   : > { %v299_v19 = vrot.slane %v295_v11, 4  ;;  %v305_v20 = vrot.slane %v296_v12, 4  ;;  %v311_v21 = vrot.slane %v297_v13, 4  ;;  %v317_v22 = vrot.slane %v298_v14, 4 }
  0x53   : > { %v342_v23 = vrot.slane %v338_v15, 4  ;;  %v348_v24 = vrot.slane %v339_v16, 4  ;;  %v354_v25 = vrot.slane %v340_v17, 4  ;;  %v360_v26 = vrot.slane %v341_v18, 4  ;;  %s611_s7 = sshll.u32 %s1274_s30, 1 }
  0x54   : > { %v300_v27 = vadd.f32 %v299_v19, %v295_v11  ;;  %v306_v28 = vadd.f32 %v305_v20, %v296_v12  ;;  %v312_v29 = vadd.f32 %v311_v21, %v297_v13  ;;  %v318_v30 = vadd.f32 %v317_v22, %v298_v14  ;;  %s453_s29 = sadd.s32 %s1275_s2, %s611_s7 }
  0x55   : > { %v343_v31 = vadd.f32 %v342_v23, %v338_v15  ;;  %v349_v32 = vadd.f32 %v348_v24, %v339_v16  ;;  %v355_v33 = vadd.f32 %v354_v25, %v340_v17  ;;  %v361_v34 = vadd.f32 %v360_v26, %v341_v18  ;;  %s612_s10 = sshll.u32 %s1276_s28, 3 }
  0x56   : > { %v301_v35 = vrot.slane %v300_v27, 2  ;;  %v307_v36 = vrot.slane %v306_v28, 2  ;;  %v313_v37 = vrot.slane %v312_v29, 2  ;;  %v319_v38 = vrot.slane %v318_v30, 2  ;;  %s455_s3 = sadd.s32 %s612_s10, %s453_s29  ;;  %s852_s30 = scalar_lea.hbm %s1278_s27, 64 }
  0x57   : > { %v344_v39 = vrot.slane %v343_v31, 2  ;;  %v350_v40 = vrot.slane %v349_v32, 2  ;;  %v356_v41 = vrot.slane %v355_v33, 2  ;;  %v362_v42 = vrot.slane %v361_v34, 2  ;;  %s613_s4 = sshll.u32 %s455_s3, 2 }
  0x58   : > { %v302_v43 = vadd.f32 %v301_v35, %v300_v27  ;;  %v308_v44 = vadd.f32 %v307_v36, %v306_v28  ;;  %v314_v45 = vadd.f32 %v313_v37, %v312_v29  ;;  %v320_v46 = vadd.f32 %v319_v38, %v318_v30  ;;  %s457_s23 = scalar_lea.hbm %s1278_s27, %s613_s4 }
  0x59   : > { %v345_v47 = vadd.f32 %v344_v39, %v343_v31  ;;  %v351_v48 = vadd.f32 %v350_v40, %v349_v32  ;;  %v357_v49 = vadd.f32 %v356_v41, %v355_v33  ;;  %v363_v50 = vadd.f32 %v362_v42, %v361_v34  ;;  %s461_s9 = sshll.u32 %s457_s23, 4  ;;  %s462_s9 = int_to_ptr.hbm [resolvable:$true] %s461_s9 }
  0x5a   : > { %v303_v51 = vrot.slane %v302_v43, 1  ;;  %v309_v52 = vrot.slane %v308_v44, 1  ;;  %v315_v53 = vrot.slane %v314_v45, 1  ;;  %v321_v54 = vrot.slane %v320_v46, 1  ;;  %s846_s22 = sshra.s32 %s462_s9, 4  ;;  %s847_s22 = int_to_ptr.hbm [resolvable:$true] %s846_s22 }
  0x5b   : > { %v346_v55 = vrot.slane %v345_v47, 1  ;;  %v352_v56 = vrot.slane %v351_v48, 1  ;;  %v358_v57 = vrot.slane %v357_v49, 1  ;;  %v364_v58 = vrot.slane %v363_v50, 1  ;;  %s848_s26 = scalar_lea.hbm %s847_s22, 4  ;;  %p853_p12 = scmp.lt.s32.totalorder %s847_s22, %s1278_s27 }
  0x5c   : > { %v304_v59 = vadd.f32 %v303_v51, %v302_v43  ;;  %v310_v60 = vadd.f32 %v309_v52, %v308_v44  ;;  %v316_v61 = vadd.f32 %v315_v53, %v314_v45  ;;  %v322_v62 = vadd.f32 %v321_v54, %v320_v46  ;;  %v418_v44 = vld [vmem:[#allocation8] sm:$0xf]  ;;  %p849_p3 = scmp.ne.s32.totalorder %s847_s22, %s848_s26  ;;  %p854_p13 = scmp.lt.s32.totalorder %s852_s30, %s848_s26 }
  0x5d   : > { %v347_v63 = vadd.f32 %v346_v55, %v345_v47  ;;  %v353_v0 = vadd.f32 %v352_v56, %v351_v48  ;;  %v359_v1 = vadd.f32 %v358_v57, %v357_v49  ;;  %v365_v2 = vadd.f32 %v364_v58, %v363_v50 }
  0x5e   : > { %v328_v7 = vsel %vm327_vm0, %v310_v60, %v304_v59  ;;  %v378_v8 = vmul.f32 %v1146_v3, %v1154_v10  ;;  %v379_v9 = vmul.f32 %v1148_v4, %v1154_v10  ;;  %v380_v11 = vmul.f32 %v1150_v5, %v1154_v10  ;;  %p850_p7 = pnand %p849_p3, %p1052_p8  ;;  %p855_p0 = por %p854_p13, %p853_p12 }
  0x5f   : > { %v330_v12 = vsel %vm329_vm1, %v316_v61, %v328_v7  ;;  %v370_v13 = vsel %vm327_vm0, %v353_v0, %v347_v63  ;;  %v381_v14 = vmul.f32 %v1152_v6, %v1154_v10 }
  0x60   : > { %v332_v15 = vsel %vm331_vm2, %v322_v62, %v330_v12  ;;  %v371_v16 = vsel %vm329_vm1, %v359_v1, %v370_v13  ;;  %v382_v17 = vrot.slane %v378_v8, 4  ;;  %v388_v18 = vrot.slane %v379_v9, 4  ;;  %p851_p11 = pneg %p850_p7 }
  0x61   : > { %334 = vst [vmem:[#allocation2] sm:$0xf] %v332_v15  ;;  %v372_v3 = vsel %vm331_vm2, %v365_v2, %v371_v16  ;;  %v394_v4 = vrot.slane %v380_v11, 4  ;;  %v400_v19 = vrot.slane %v381_v14, 4 }
  0x62   : > { %374 = vst [vmem:[#allocation2 + $0x4] sm:$0xf] %v372_v3  ;;  %v383_v5 = vadd.f32 %v382_v17, %v378_v8  ;;  %v389_v20 = vadd.f32 %v388_v18, %v379_v9  ;;  %p856_p1 = pnand %p855_p0, %p851_p11 }
  0x63   : > { %v395_v21 = vadd.f32 %v394_v4, %v380_v11  ;;  %v401_v22 = vadd.f32 %v400_v19, %v381_v14 }
  0x64   : > { %v384_v23 = vrot.slane %v383_v5, 2  ;;  %v390_v24 = vrot.slane %v389_v20, 2 }
  0x65   : > { %v396_v25 = vrot.slane %v395_v21, 2  ;;  %v402_v6 = vrot.slane %v401_v22, 2 }
  0x66   : > { %v385_v10 = vadd.f32 %v384_v23, %v383_v5  ;;  %v391_v26 = vadd.f32 %v390_v24, %v389_v20 }
  0x67   : > { %v397_v27 = vadd.f32 %v396_v25, %v395_v21  ;;  %v403_v28 = vadd.f32 %v402_v6, %v401_v22 }
  0x68   : > { %v386_v29 = vrot.slane %v385_v10, 1  ;;  %v392_v30 = vrot.slane %v391_v26, 1 }
  0x69   : > { %v398_v31 = vrot.slane %v397_v27, 1  ;;  %v404_v32 = vrot.slane %v403_v28, 1  ;;  %v415_v40 = vld [vmem:[#allocation2] sm:$0xff] }
  0x6a   : > { %v387_v33 = vadd.f32 %v386_v29, %v385_v10  ;;  %v393_v34 = vadd.f32 %v392_v30, %v391_v26 }
  0x6b   : > { %v399_v35 = vadd.f32 %v398_v31, %v397_v27  ;;  %v405_v36 = vadd.f32 %v404_v32, %v403_v28 }
  0x6c   : > { %v410_v37 = vsel %vm327_vm0, %v393_v34, %v387_v33 }
  0x6d   : > { %v411_v38 = vsel %vm329_vm1, %v399_v35, %v410_v37 }
  0x6e   : > { %v412_v39 = vsel %vm331_vm2, %v405_v36, %v411_v38 }
  0x6f   : > { %414 = vst [vmem:[#allocation2 + $0x8] sm:$0xf] %v412_v39 }
  0x76   : > { %v416_v41 = vld [vmem:[#allocation2 + $0x8] sm:$0xf] }
  0x77   : > { %v417_v42 = vpack.c.bf16 %v416_v41, %v415_v40 }
  0x79   : > { %v425_v43 = vsel %vm423_vm3, %v417_v42, 0 }
  0x7a   : > { %434 = vmatpush.bf16.msra.mxu0 %v425_v43 }
  0x7d   : > { %609 = vmatmul.msk.bf16.vlgmr.msra.gmra.mxu0 %vm419_vm4, %v418_v44 }
  0xfa   : > { %v436_v45 = vpop.f32.mrf.mxu0 }
  0xfb   : > { %v440_v46 = vpack.c.bf16 %v436_v45, %v436_v45 }
  0xfd   : > { %441 = vst [vmem:[%s283_s15] sm:$0xf] %v440_v46 }
  0xfe   : > { %859 = shalt.err (!%p856_p1)
}
  0xff   : > { %637 = dma.vmem_to_hbm [thread:$0]  (%p1052_p8), %s460_s16, 64, %s462_s9, %s443_s11  }
 0x102   : > { %v438_v47 = vpop.f32.mrf.mxu0 }
 0x103 PF: > { %s1279_s17 = sld [smem:[#allocation14_spill]]  ;;  %p657_p2 = scmp.ge.s32.totalorder %s954_s21, 2 }
 0x105   : > { %p651_p4 = pnand %p657_p2, %p1056_p9 }
 0x107   : > { %p652_p5 = pneg %p651_p4 }
 0x109   : > { %s473_s29 = sand.u32 1, %s1279_s17  }
 0x10a   : > { %s474_s10 = scalar_lea.sflag [#allocation5], %s473_s29 }
 0x10b   : > { %913 = dma.done.wait (%p652_p5), %s474_s10, 64  }
 0x10c   : > { %915 = vsyncadd (%p652_p5), %s474_s10, 4294967232  ;;  %s22_s21 = sadd.s32 1, %s954_s21   ;;  %s1281_s3 = sld [smem:[#allocation22_spill]] }
 0x10d   : > { %p19_p6 = scmp.ge.s32.totalorder %s22_s21, 18   ;;  %s1282_s4 = sld [smem:[#allocation23_spill]] }
 0x10e   : > { %s1283_s25 = sld [smem:[#allocation24_spill]]  ;;  %s1284_s12 = smov %s922_s13 }
 0x10f   : > { %s1285_s13 = smov %s926_s14  ;;  %s1286_s14 = smov %s1113_s0 }
 0x110   : > { %s1287_s15 = smov %s942_s18  ;;  %s1288_s16 = smov %s946_s19 }
 0x111   : > { %s1289_s17 = smov %s950_s20  ;;  %21 = sbr.rel (!%p19_p6) target bundleno = 14 (0xe), region = 96 }
 0x112   : > { %s1290_s18 = smov %s1281_s3 }
 0x113   : > { %s1291_s19 = smov %s1282_s4 }
 0x114   : > { %s1292_s20 = smov %s1283_s25 }
 0x116   :  { %480 = vsyncpa [#allocation4], 1 }
 0x117   :  { %482 = vsyncpa [#allocation4 + $0x1], 1 }
 0x118   :  { %483 = vsyncpa [#allocation7], 1 }
 0x119   :  { %485 = vsyncpa [#allocation7 + $0x1], 1 }
 0x11a   :  { %486 = vsyncpa [#allocation5], 1 }
 0x11b   :  { %488 = vsyncpa [#allocation5 + $0x1], 1 }

</bundles_post_ra>
